<compile_context>
chip_gen: v7x
topology: tpu7x:2x2x1
jax: 0.10.0
libtpu: 0.0.40
codegen_flags: <defaults>
</compile_context>

<pallas_src>
import functools

import jax
import jax.numpy as jnp
from jax.experimental import pallas as pl
from jax.experimental.pallas import tpu as pltpu


# ----------------------------- Linear kernels -----------------------------

def _linear_full_kernel(x_ref, w_ref, b_ref, o_ref):
    acc = jnp.dot(x_ref[...], w_ref[...], preferred_element_type=jnp.float32)
    o_ref[...] = (acc + b_ref[...].astype(jnp.float32)).astype(o_ref.dtype)


def _linear_tiled_kernel(x_ref, w_ref, b_ref, o_ref, acc_ref):
    @pl.when(pl.program_id(2) == 0)
    def _():
        acc_ref[...] = jnp.zeros_like(acc_ref)

    acc_ref[...] += jnp.dot(x_ref[...], w_ref[...],
                            preferred_element_type=jnp.float32)

    @pl.when(pl.program_id(2) == pl.num_programs(2) - 1)
    def _():
        o_ref[...] = (acc_ref[...] + b_ref[...].astype(jnp.float32)).astype(
            o_ref.dtype)


def linear(x2d, w, b=None, *, tm=128, tn=128, tk=256):
    """y = x2d @ w + b  (b optional), computed with Pallas kernels."""
    M, K = x2d.shape
    K2, N = w.shape
    assert K == K2, (K, K2)
    out_dtype = x2d.dtype
    b2d = (jnp.zeros((1, N), dtype=out_dtype) if b is None
           else b.reshape(1, N).astype(out_dtype))

    if M % tm == 0 and N % tn == 0 and K % tk == 0:
        # MXU-tiled path: lane/sublane-dense 128x128 output tiles, f32 acc.
        return pl.pallas_call(
            _linear_tiled_kernel,
            out_shape=jax.ShapeDtypeStruct((M, N), out_dtype),
            grid=(M // tm, N // tn, K // tk),
            in_specs=[
                pl.BlockSpec((tm, tk), lambda i, j, k: (i, k)),
                pl.BlockSpec((tk, tn), lambda i, j, k: (k, j)),
                pl.BlockSpec((1, tn), lambda i, j, k: (0, j)),
            ],
            out_specs=pl.BlockSpec((tm, tn), lambda i, j, k: (i, j)),
            scratch_shapes=[pltpu.VMEM((tm, tn), jnp.float32)],
            compiler_params=pltpu.CompilerParams(
                dimension_semantics=("parallel", "parallel", "arbitrary")),
        )(x2d, w, b2d)

    # Small / unaligned shapes: one full-extent block (always legal on TPU).
    return pl.pallas_call(
        _linear_full_kernel,
        out_shape=jax.ShapeDtypeStruct((M, N), out_dtype),
        grid=(1,),
        in_specs=[
            pl.BlockSpec((M, K), lambda i: (0, 0)),
            pl.BlockSpec((K, N), lambda i: (0, 0)),
            pl.BlockSpec((1, N), lambda i: (0, 0)),
        ],
        out_specs=pl.BlockSpec((M, N), lambda i: (0, 0)),
    )(x2d, w, b2d)


# ----------------------- Multi-head attention kernel -----------------------

def _attn_core_kernel(q_ref, k_ref, v_ref, o_ref, *, scale):
    # Blocks are (1, H, L, D); process all heads of one batch element.
    q = q_ref[0].astype(jnp.float32) * scale          # (H, L, D)
    k = k_ref[0].astype(jnp.float32)                  # (H, L, D)
    v = v_ref[0].astype(jnp.float32)                  # (H, L, D)

    s = jnp.einsum('hid,hjd->hij', q, k,
                   preferred_element_type=jnp.float32)  # (H, L, L)
    s = s - jnp.max(s, axis=-1, keepdims=True)
    p = jnp.exp(s)
    p = p / jnp.sum(p, axis=-1, keepdims=True)          # softmax, f32

    o = jnp.einsum('hij,hjd->hid', p, v,
                   preferred_element_type=jnp.float32)  # (H, L, D)
    o_ref[0] = o.astype(o_ref.dtype)


def multi_head_attention(q, k, v, scale):
    """q, k, v: (B, H, L, D) -> (B, H, L, D) = softmax(q*scale @ k^T) @ v."""
    B, H, L, D = q.shape
    kernel = functools.partial(_attn_core_kernel, scale=scale)
    spec = pl.BlockSpec((1, H, L, D), lambda b: (b, 0, 0, 0))
    return pl.pallas_call(
        kernel,
        out_shape=jax.ShapeDtypeStruct((B, H, L, D), q.dtype),
        grid=(B,),
        in_specs=[spec, spec, spec],
        out_specs=spec,
        compiler_params=pltpu.CompilerParams(
            dimension_semantics=("parallel",)),
    )(q, k, v)


# ------------------------------ Full forward -------------------------------

def attention_forward(x, params, num_heads):
    """Eval-mode forward of the PyTorch Attention module.

    params:
      w_qkv:  (C, 3C)   == PyTorch qkv.weight.T   (no bias in the module)
      w_proj: (C, C)    == PyTorch proj.weight.T
      b_proj: (C,)      == PyTorch proj.bias
    """
    B, L, C = x.shape
    H = num_heads
    D = C // H
    scale = float(D) ** -0.5

    x2d = x.reshape(B * L, C)
    qkv = linear(x2d, params["w_qkv"], None)           # (B*L, 3C)
    qkv = qkv.reshape(B, L, 3, H, D)
    q = jnp.transpose(qkv[:, :, 0], (0, 2, 1, 3))      # (B, H, L, D)
    k = jnp.transpose(qkv[:, :, 1], (0, 2, 1, 3))
    v = jnp.transpose(qkv[:, :, 2], (0, 2, 1, 3))

    o = multi_head_attention(q, k, v, scale)           # (B, H, L, D)
    o = jnp.transpose(o, (0, 2, 1, 3)).reshape(B * L, C)

    out = linear(o, params["w_proj"], params["b_proj"])  # (B*L, C)
    return out.reshape(B, L, C)


# ----------------------------- Plain-JAX reference --------------------------

def attention_ref(x, params, num_heads):
    B, L, C = x.shape
    H = num_heads
    D = C // H
    scale = float(D) ** -0.5
    qkv = x @ params["w_qkv"]
    qkv = qkv.reshape(B, L, 3, H, D)
    q = jnp.transpose(qkv[:, :, 0], (0, 2, 1, 3)) * scale
    k = jnp.transpose(qkv[:, :, 1], (0, 2, 1, 3))
    v = jnp.transpose(qkv[:, :, 2], (0, 2, 1, 3))
    attn = jnp.einsum('bhid,bhjd->bhij', q, k)
    attn = jax.nn.softmax(attn, axis=-1)
    o = jnp.einsum('bhij,bhjd->bhid', attn, v)
    o = jnp.transpose(o, (0, 2, 1, 3)).reshape(B, L, C)
    return o @ params["w_proj"] + params["b_proj"]


if __name__ == "__main__":
    key = jax.random.PRNGKey(0)
    kx, kp, kx2, kp2 = jax.random.split(key, 4)

    def make_params(k, C):
        k1, k2, k3 = jax.random.split(k, 3)
        return {
            "w_qkv": jax.random.normal(k1, (C, 3 * C), jnp.float32) * (C ** -0.5),
            "w_proj": jax.random.normal(k2, (C, C), jnp.float32) * (C ** -0.5),
            "b_proj": jax.random.normal(k3, (C,), jnp.float32) * 0.02,
        }

    # Small shapes consistent with the module: batch=2, seq=8, hidden=32, 8 heads.
    B, L, C, H = 2, 8, 32, 8
    x = jax.random.normal(kx, (B, L, C), jnp.float32)
    params = make_params(kp, C)

    y = jax.block_until_ready(attention_forward(x, params, H))
    y_ref = attention_ref(x, params, H)
    assert y.shape == (B, L, C)
    assert jnp.allclose(y, y_ref, atol=1e-4, rtol=1e-4), "small-shape mismatch"

    # Larger, MXU-tile-aligned shapes exercise the tiled matmul path.
    B2, L2, C2, H2 = 2, 64, 256, 8
    x2 = jax.random.normal(kx2, (B2, L2, C2), jnp.float32)
    params2 = make_params(kp2, C2)
    y2 = jax.block_until_ready(attention_forward(x2, params2, H2))
    y2_ref = attention_ref(x2, params2, H2)
    assert jnp.allclose(y2, y2_ref, atol=5e-4, rtol=5e-4), "tiled-path mismatch"

    print("KERNEL_OK")
</pallas_src>

<mosaic_0001>
module attributes {stable_mosaic.version = 11 : i64} {
  func.func @_linear_full_kernel(%arg0: i32, %arg1: memref<16x32xf32, #tpu.memory_space<vmem>>, %arg2: memref<32x96xf32, #tpu.memory_space<vmem>>, %arg3: memref<1x96xf32, #tpu.memory_space<vmem>>, %arg4: memref<16x96xf32, #tpu.memory_space<vmem>>) attributes {dimension_semantics = [#tpu.dimension_semantics<arbitrary>], iteration_bounds = array<i64: 1>, scalar_prefetch = 0 : i64, scratch_operands = 0 : i64, tpu.core_type = #tpu.core_type<tc>, window_params = [{pipeline_mode = #tpu.pipeline_mode<synchronous>, transform_indices = @transform_0, window_bounds = array<i64: 16, 32>}, {pipeline_mode = #tpu.pipeline_mode<synchronous>, transform_indices = @transform_1, window_bounds = array<i64: 32, 96>}, {pipeline_mode = #tpu.pipeline_mode<synchronous>, transform_indices = @transform_2, window_bounds = array<i64: 1, 96>}, {pipeline_mode = #tpu.pipeline_mode<synchronous>, transform_indices = @transform_3, window_bounds = array<i64: 16, 96>}]} {
    %c0 = arith.constant 0 : index
    %c0_0 = arith.constant 0 : index
    %0 = vector.load %arg1[%c0, %c0_0] : memref<16x32xf32, #tpu.memory_space<vmem>>, vector<16x32xf32>
    %c0_1 = arith.constant 0 : index
    %c0_2 = arith.constant 0 : index
    %1 = vector.load %arg2[%c0_1, %c0_2] : memref<32x96xf32, #tpu.memory_space<vmem>>, vector<32x96xf32>
    %cst = arith.constant dense<0.000000e+00> : vector<16x96xf32>
    %2 = tpu.matmul %0, %1, %cst {dimension_numbers = #tpu.dot_dimension_numbers<[1], [0], [0], [1], [0, 0, 1, 1], [], []>} : vector<16x32xf32>, vector<32x96xf32>, vector<16x96xf32> -> vector<16x96xf32>
    %c0_3 = arith.constant 0 : index
    %c0_4 = arith.constant 0 : index
    %3 = vector.load %arg3[%c0_3, %c0_4] : memref<1x96xf32, #tpu.memory_space<vmem>>, vector<1x96xf32>
    %4 = vector.broadcast %3 : vector<1x96xf32> to vector<16x96xf32>
    %5 = arith.addf %2, %4 : vector<16x96xf32>
    %c0_5 = arith.constant 0 : index
    %c0_6 = arith.constant 0 : index
    %6 = vector.load %arg4[%c0_5, %c0_6] : memref<16x96xf32, #tpu.memory_space<vmem>>, vector<16x96xf32>
    tpu.vector_store %arg4[%c0_5, %c0_6], %5 {strides = array<i32>} : memref<16x96xf32, #tpu.memory_space<vmem>>, vector<16x96xf32>,
    return
  }
  func.func @transform_0(%arg0: i32) -> (i32, i32) {
    %c0_i32 = arith.constant 0 : i32
    %c0_i32_0 = arith.constant 0 : i32
    %c0_i32_1 = arith.constant 0 : i32
    return %c0_i32, %c0_i32_0 : i32, i32
  }
  func.func @transform_1(%arg0: i32) -> (i32, i32) {
    %c0_i32 = arith.constant 0 : i32
    %c0_i32_0 = arith.constant 0 : i32
    %c0_i32_1 = arith.constant 0 : i32
    return %c0_i32, %c0_i32_0 : i32, i32
  }
  func.func @transform_2(%arg0: i32) -> (i32, i32) {
    %c0_i32 = arith.constant 0 : i32
    %c0_i32_0 = arith.constant 0 : i32
    %c0_i32_1 = arith.constant 0 : i32
    return %c0_i32, %c0_i32_0 : i32, i32
  }
  func.func @transform_3(%arg0: i32) -> (i32, i32) {
    %c0_i32 = arith.constant 0 : i32
    %c0_i32_0 = arith.constant 0 : i32
    %c0_i32_1 = arith.constant 0 : i32
    return %c0_i32, %c0_i32_0 : i32, i32
  }
}

</mosaic_0001>

<bundles_post_ra>
// kernel: tpu_custom_call.1
= control target key start
LH: loop header
LB: loop body
LE: loop exit
PB: predicated region body
PF: predicated region fallthrough
CT: control target
= control target key end

     0   :  { %8 = vsyncpa [#allocation3], 0  ;;  %s337_s0 = inlined_call_operand.hbm [shape: f32[16,32], index: 0, kind: input, shape index: {}]   ;;  %s338_s1 = inlined_call_operand.hbm [shape: f32[32,96], index: 1, kind: input, shape index: {}]   ;;  %s339_s2 = inlined_call_operand.vmem [shape: f32[1,96], index: 2, kind: input, shape index: {}]   ;;  %s340_s3 = inlined_call_operand.hbm [shape: f32[16,96], index: 3, kind: output, shape index: {}]  }
   0x1   :  { %9 = vsyncpa [#allocation6], 0 }
   0x2   :  { %10 = vsyncpa [#allocation4], 0  ;;  %s264_s12 = smov [#allocation2]   ;;  %s192_s16 = scalar_lea.hbm %s337_s0, 256 }
   0x3   :  { %s16_s13 = sshll.u32 %s264_s12, 4  ;;  %p193_p0 = scmp.ne.s32.totalorder %s337_s0, %s192_s16  ;;  %s17_s13 = int_to_ptr.vmem [resolvable:$true] %s16_s13 }
   0x4   :  { %p196_p1 = scmp.lt.u32.totalorder %s192_s16, %s337_s0 }
   0x6   :  { %p198_p2 = pnand %p196_p1, %p193_p0 }
   0x8   :  { %201 = shalt.err (!%p198_p2)
}
   0x9   :  { %s202_s21 = scalar_lea.vmem %s17_s13, 256  ;;  %p207_p4 = scmp.lt.s32.totalorder %s17_s13, %s17_s13 }
   0xa   :  { %p203_p3 = scmp.ne.s32.totalorder %s17_s13, %s202_s21  ;;  %p208_p5 = scmp.lt.s32.totalorder %s202_s21, %s202_s21 }
   0xc   :  { %p209_p6 = por %p208_p5, %p207_p4 }
   0xe   :  { %p210_p7 = pnand %p209_p6, %p203_p3 }
  0x10   :  { %213 = shalt.err (!%p210_p7)
}
  0x11   :  { %s265_s22 = smov 128   ;;  %s266_s23 = smov 8  }
  0x12   :  { %22 = dma.hbm_to_vmem [thread:$0]  %s337_s0, 256, %s17_s13, [#allocation3], %s265_s22, %s265_s22, %s266_s23  }
  0x13   :  { %s267_s26 = smov [#allocation5]   ;;  %s214_s30 = scalar_lea.hbm %s338_s1, 512 }
  0x14   :  { %s28_s27 = sshll.u32 %s267_s26, 4  ;;  %p215_p8 = scmp.ne.s32.totalorder %s338_s1, %s214_s30  ;;  %s29_s27 = int_to_ptr.vmem [resolvable:$true] %s28_s27 }
  0x15   :  { %p218_p9 = scmp.lt.u32.totalorder %s214_s30, %s338_s1 }
  0x17   :  { %p220_p10 = pnand %p218_p9, %p215_p8 }
  0x19   :  { %223 = shalt.err (!%p220_p10)
}
  0x1a   :  { %s224_s8 = scalar_lea.vmem %s29_s27, 512  ;;  %p229_p12 = scmp.lt.s32.totalorder %s29_s27, %s29_s27 }
  0x1b   :  { %p225_p11 = scmp.ne.s32.totalorder %s29_s27, %s224_s8  ;;  %p230_p13 = scmp.lt.s32.totalorder %s224_s8, %s224_s8 }
  0x1d   :  { %p231_p0 = por %p230_p13, %p229_p12 }
  0x1f   :  { %p232_p1 = pnand %p231_p0, %p225_p11 }
  0x21   :  { %235 = shalt.err (!%p232_p1)
}
  0x22   :  { %34 = dma.hbm_to_vmem [thread:$0]  %s338_s1, 512, %s29_s27, [#allocation6], %s265_s22, %s265_s22, %s266_s23  }
  0x23   :  { %258 = dma.done.wait [#allocation3], 256  }
  0x24   :  { %259 = vsyncadd [#allocation3], 4294967040 }
  0x25   :  { %260 = dma.done.wait [#allocation6], 512  }
  0x26   :  { %261 = vsyncadd [#allocation6], 4294966784  ;;  %vm56_vm0 = vcmask 261120   ;;  %v45_v0 = vld [vmem:[#allocation5] sm:$0xff]  ;;  %v46_v1 = vld [vmem:[#allocation5 + $0x8] sm:$0xff]  ;;  %s268_s11 = smov [#allocation7]  }
  0x27   :  { %v47_v2 = vld [vmem:[#allocation5 + $0x10] sm:$0xff]  ;;  %v179_v3 = vpack.c.bf16 %v46_v1, %v45_v0  ;;  %v48_v4 = vld [vmem:[#allocation5 + $0x18] sm:$0xff]  ;;  %s146_s12 = sshll.u32 %s268_s11, 4  ;;  %vm138_vm1 = vcmask 785408   ;;  %s147_s12 = int_to_ptr.vmem [resolvable:$true] %s146_s12 }
  0x28   :  { %v43_v5 = vld [vmem:[#allocation2] sm:$0xff]  ;;  %v183_v6 = vpack.c.bf16 %v48_v4, %v47_v2  ;;  %v44_v7 = vld [vmem:[#allocation2 + $0x8] sm:$0xff]  ;;  %s236_s13 = scalar_lea.vmem %s147_s12, 256  ;;  %p241_p3 = scmp.lt.s32.totalorder %s147_s12, %s147_s12 }
  0x29   :  { %176 = vmatprep.mubr.msk.f32.mxu0 %vm56_vm0, %v43_v5  ;;  %180 = vmatprep.subr.bf16.mxu0 %v179_v3  ;;  %v159_v8 = vld [vmem:[%s339_s2] ss:$0 sm:$0xff]  ;;  %p237_p2 = scmp.ne.s32.totalorder %s147_s12, %s236_s13  ;;  %p242_p4 = scmp.lt.s32.totalorder %s236_s13, %s236_s13 }
  0x2a   :  { %182 = vmatpush3.bf16.msra.mxu0 %v179_v3 }
  0x2b   :  { %184 = vmatprep.subr.bf16.mxu0 %v183_v6  ;;  %p243_p5 = por %p242_p4, %p241_p3 }
  0x2d   :  { %p244_p6 = pnand %p243_p5, %p237_p2 }
  0x2e   :  { %186 = vmatpush3.bf16.msra.mxu0 %v183_v6 }
  0x31   :  { %177 = vmatmul.mubr.msk.f32.vlgmr.msra.gmra.mrb[0].mxu0 %vm56_vm0, %v44_v7 }
 0x104   :  { %v178_v9 = vpop.f32.mrb[0].mxu0 }
 0x105   :  { %v135_v10 = vadd.f32 %v178_v9, %v159_v8  ;;  %v129_v11 = vpop.f32.mrb[1].mxu0 }
 0x106   :  { %v130_v12 = vadd.f32 %v159_v8, %v129_v11 }
 0x107   :  { %140 = vst.msk [vmem:[#allocation7 + $0x8] sm:$0xff] %vm138_vm1, %v135_v10 }
 0x108   :  { %139 = vst.msk [vmem:[#allocation7] sm:$0xff] %vm138_vm1, %v130_v12 }
 0x109   :  { %247 = shalt.err (!%p244_p6)
}
 0x10a   :  { %s248_s2 = scalar_lea.hbm %s340_s3, 256 }
 0x10b   :  { %p249_p7 = scmp.ne.s32.totalorder %s340_s3, %s248_s2  ;;  %p252_p8 = scmp.lt.u32.totalorder %s248_s2, %s340_s3 }
 0x10d   :  { %p254_p9 = pnand %p252_p8, %p249_p7 }
 0x10f   :  { %257 = shalt.err (!%p254_p9)
}
 0x110   :  { %152 = dma.vmem_to_hbm [thread:$0]  %s147_s12, 256, %s340_s3, [#allocation4], %s265_s22, %s265_s22, %s266_s23  }
 0x111   :  { %262 = dma.done.wait [#allocation4], 256  }
 0x112   :  { %263 = vsyncadd [#allocation4], 4294967040 }
 0x113   :  { %156 = vsyncpa [#allocation3], 1 }
 0x114   :  { %157 = vsyncpa [#allocation6], 1 }
 0x115   :  { %158 = vsyncpa [#allocation4], 1 }

</bundles_post_ra>
